<compile_context>
chip_gen: v5e
topology: v5e:2x2
jax: 0.10.0
libtpu: 0.0.40
codegen_flags: <defaults>
</compile_context>

<pallas_src>
import jax
import jax.numpy as jnp
from jax.experimental import pallas as pl
from jax.experimental.pallas import tpu as pltpu


def _round_up(x: int, m: int) -> int:
    return ((x + m - 1) // m) * m


def _choose_tile_b(B: int, K: int, C: int, *, x_bytes: int, w_bytes: int,
                   max_tile_b: int = 256, vmem_budget: int = 8 << 20) -> int:
    """Batch tile: multiple of 8 (or == B for tiny batches), capped so
    (a) v7x's two TensorCores both get grid steps once B >= 256, and
    (b) double-buffered x/out tiles + resident W/b stay under ~8 MiB VMEM
        (binding limit is v5e's 16 MiB default scoped VMEM, not physical)."""
    if B <= 8:
        return B                      # block dim == full array dim -> legal
    tile = min(max_tile_b, _round_up(B, 8))
    if B >= 256:
        # Ensure >= 2 grid steps so dimension_semantics=("parallel",) can
        # shard across both v7x TensorCores.
        tile = min(tile, max(128, _round_up(pl.cdiv(_round_up(B, 8), 2), 8)))

    def vmem_need(t: int) -> int:
        return (2 * t * K * x_bytes      # double-buffered x tile
                + 2 * t * C * 4          # double-buffered out tile (f32)
                + K * C * w_bytes        # resident weight
                + C * 4)                 # resident bias

    while tile > 8 and vmem_need(tile) > vmem_budget:
        tile = max(8, _round_up(tile // 2, 8))
    return tile


def _classifier_kernel(x_ref, w_ref, b_ref, o_ref):
    # x_ref: (TILE_B, K) f32/bf16, w_ref: (K, C) bf16, b_ref: (1, C) f32,
    # o_ref: (TILE_B, C) f32.
    # Cast activations to bf16 on the VPU (hidden under the DMA); the MXU
    # accumulates in f32.  Bias add stays in-kernel (one VPU add, free).
    x = x_ref[...].astype(jnp.bfloat16)
    logits = jnp.dot(x, w_ref[...], preferred_element_type=jnp.float32)
    o_ref[...] = logits + b_ref[...]


def classifier_forward(features, weight_t, bias, *, max_tile_b: int = 256):
    """features: (B, 2H); weight_t: (2H, C) bf16; bias: (1, C) f32.

    Returns logits (B, C) float32.  No wrapper-side padding/cast/slice ops.
    """
    B, K = features.shape
    K_w, C = weight_t.shape
    assert K == K_w, (K, K_w)
    assert bias.shape == (1, C), bias.shape

    tile_b = _choose_tile_b(
        B, K, C,
        x_bytes=features.dtype.itemsize,
        w_bytes=weight_t.dtype.itemsize,
        max_tile_b=max_tile_b,
    )
    grid = (pl.cdiv(B, tile_b),)

    # True (unpadded) cost so XLA schedules this tiny call realistically.
    cost = pl.CostEstimate(
        flops=2 * B * K * C,
        transcendentals=0,
        bytes_accessed=(
            features.size * features.dtype.itemsize
            + weight_t.size * weight_t.dtype.itemsize
            + bias.size * bias.dtype.itemsize
            + B * C * 4
        ),
    )

    return pl.pallas_call(
        _classifier_kernel,
        out_shape=jax.ShapeDtypeStruct((B, C), jnp.float32),
        grid=grid,
        in_specs=[
            pl.BlockSpec((tile_b, K), lambda i: (i, 0)),   # batch-tiled x, full K
            pl.BlockSpec((K, C), lambda i: (0, 0)),        # full weight (resident)
            pl.BlockSpec((1, C), lambda i: (0, 0)),        # full bias (resident)
        ],
        out_specs=pl.BlockSpec((tile_b, C), lambda i: (i, 0)),
        compiler_params=pltpu.CompilerParams(
            dimension_semantics=("parallel",),
        ),
        cost_estimate=cost,
    )(features, weight_t, bias)


def init_classifier_params(key, lstm_hidden_dim, num_classes=2):
    """Deterministic init mimicking nn.Linear default (uniform +-1/sqrt(fan_in)).

    Padding/casting/reshaping is hoisted here (once, free at runtime):
      * weight stored transposed (in_features, num_classes) and in bf16,
      * bias stored 2-D (1, num_classes) float32.
    """
    in_features = 2 * lstm_hidden_dim
    kw, kb = jax.random.split(key)
    bound = 1.0 / jnp.sqrt(jnp.float32(in_features))
    weight_t = jax.random.uniform(
        kw, (in_features, num_classes), jnp.float32, -bound, bound
    )
    bias = jax.random.uniform(kb, (num_classes,), jnp.float32, -bound, bound)
    return weight_t.astype(jnp.bfloat16), bias.reshape(1, num_classes)


if __name__ == "__main__":
    key = jax.random.PRNGKey(0)
    k_feat, k_param = jax.random.split(key)

    lstm_hidden_dim = 32          # -> in_features = 2 * 32 = 64
    num_classes = 2
    batch = 2

    features = jax.random.normal(
        k_feat, (batch, 2 * lstm_hidden_dim), dtype=jnp.float32
    )
    weight_t, bias = init_classifier_params(k_param, lstm_hidden_dim, num_classes)

    logits = jax.jit(classifier_forward)(features, weight_t, bias)
    jax.block_until_ready(logits)

    assert logits.shape == (batch, num_classes), logits.shape

    # Reference 1: same bf16 operand rounding, f32 accumulation (tight check).
    ref_bf16 = (
        jnp.dot(
            features.astype(jnp.bfloat16),
            weight_t,
            preferred_element_type=jnp.float32,
        )
        + bias
    )
    assert jnp.allclose(logits, ref_bf16, atol=1e-3, rtol=1e-3)

    # Reference 2: full f32 math (loose sanity check on bf16 rounding error).
    ref_f32 = features @ weight_t.astype(jnp.float32) + bias
    assert jnp.allclose(logits, ref_f32, atol=5e-2, rtol=5e-2)

    print("KERNEL_OK")
</pallas_src>

<mosaic_0001>
module attributes {stable_mosaic.version = 11 : i64} {
  func.func @_classifier_kernel(%arg0: i32, %arg1: memref<2x64xf32, #tpu.memory_space<vmem>>, %arg2: memref<64x2xbf16, #tpu.memory_space<vmem>>, %arg3: memref<1x2xf32, #tpu.memory_space<vmem>>, %arg4: memref<2x2xf32, #tpu.memory_space<vmem>>) attributes {dimension_semantics = [#tpu.dimension_semantics<parallel>], iteration_bounds = array<i64: 1>, scalar_prefetch = 0 : i64, scratch_operands = 0 : i64, tpu.core_type = #tpu.core_type<tc>, window_params = [{transform_indices = @transform_0, window_bounds = array<i64: 2, 64>}, {pipeline_mode = #tpu.pipeline_mode<synchronous>, transform_indices = @transform_1, window_bounds = array<i64: 64, 2>}, {pipeline_mode = #tpu.pipeline_mode<synchronous>, transform_indices = @transform_2, window_bounds = array<i64: 1, 2>}, {transform_indices = @transform_3, window_bounds = array<i64: 2, 2>}]} {
    %c0 = arith.constant 0 : index
    %c0_0 = arith.constant 0 : index
    %0 = vector.load %arg1[%c0, %c0_0] : memref<2x64xf32, #tpu.memory_space<vmem>>, vector<2x64xf32>
    %1 = arith.truncf %0 : vector<2x64xf32> to vector<2x64xbf16>
    %c0_1 = arith.constant 0 : index
    %c0_2 = arith.constant 0 : index
    %2 = vector.load %arg2[%c0_1, %c0_2] : memref<64x2xbf16, #tpu.memory_space<vmem>>, vector<64x2xbf16>
    %cst = arith.constant dense<0.000000e+00> : vector<2x2xf32>
    %3 = tpu.matmul %1, %2, %cst {dimension_numbers = #tpu.dot_dimension_numbers<[1], [0], [0], [1], [0, 0, 1, 1], [], []>} : vector<2x64xbf16>, vector<64x2xbf16>, vector<2x2xf32> -> vector<2x2xf32>
    %c0_3 = arith.constant 0 : index
    %c0_4 = arith.constant 0 : index
    %4 = vector.load %arg3[%c0_3, %c0_4] : memref<1x2xf32, #tpu.memory_space<vmem>>, vector<1x2xf32>
    %5 = vector.broadcast %4 : vector<1x2xf32> to vector<2x2xf32>
    %6 = arith.addf %3, %5 : vector<2x2xf32>
    %c0_5 = arith.constant 0 : index
    %c0_6 = arith.constant 0 : index
    %7 = vector.load %arg4[%c0_5, %c0_6] : memref<2x2xf32, #tpu.memory_space<vmem>>, vector<2x2xf32>
    tpu.vector_store %arg4[%c0_5, %c0_6], %6 {strides = array<i32>} : memref<2x2xf32, #tpu.memory_space<vmem>>, vector<2x2xf32>,
    return
  }
  func.func @transform_0(%arg0: i32) -> (i32, i32) {
    %c0_i32 = arith.constant 0 : i32
    %c0_i32_0 = arith.constant 0 : i32
    return %arg0, %c0_i32 : i32, i32
  }
  func.func @transform_1(%arg0: i32) -> (i32, i32) {
    %c0_i32 = arith.constant 0 : i32
    %c0_i32_0 = arith.constant 0 : i32
    %c0_i32_1 = arith.constant 0 : i32
    return %c0_i32, %c0_i32_0 : i32, i32
  }
  func.func @transform_2(%arg0: i32) -> (i32, i32) {
    %c0_i32 = arith.constant 0 : i32
    %c0_i32_0 = arith.constant 0 : i32
    %c0_i32_1 = arith.constant 0 : i32
    return %c0_i32, %c0_i32_0 : i32, i32
  }
  func.func @transform_3(%arg0: i32) -> (i32, i32) {
    %c0_i32 = arith.constant 0 : i32
    %c0_i32_0 = arith.constant 0 : i32
    return %arg0, %c0_i32 : i32, i32
  }
}

</mosaic_0001>

<bundles_post_ra>
// kernel: classifier_forward.1
= control target key start
LH: loop header
LB: loop body
LE: loop exit
PB: predicated region body
PF: predicated region fallthrough
CT: control target
= control target key end

     0   :  { %s180_s0 = inlined_call_operand.vmem [shape: f32[2,64], index: 0, kind: input, shape index: {}]   ;;  %s181_s1 = inlined_call_operand.vmem [shape: bf16[64,2], index: 1, kind: input, shape index: {}]   ;;  %s182_s2 = inlined_call_operand.vmem [shape: f32[1,2], index: 2, kind: input, shape index: {}]   ;;  %s183_s3 = inlined_call_operand.hbm [shape: f32[2,2], index: 3, kind: output, shape index: {}]  }
   0x1   :  { %v109_v0 = vld [vmem:[%s181_s1 + $0x18] sm:$0xff]  ;;  %v108_v1 = vld [vmem:[%s181_s1 + $0x10] sm:$0xff] }
   0x2   :  { %62 = vmatpush.bf16.msra.mxu0 %v109_v0 }
   0x3   :  { %8 = vsyncpa [#allocation3], 0  ;;  %v107_v2 = vld [vmem:[%s181_s1 + $0x8] sm:$0xff]  ;;  %v106_v3 = vld [vmem:[%s181_s1] sm:$0xff]  ;;  %vm54_vm0 = vcmask 523264   ;;  %s138_s24 = smov [#allocation2]  }
   0x4   :  { %v16_v4 = vld [vmem:[%s180_s0] sm:$0x3]  ;;  %s78_s25 = sshll.u32 %s138_s24, 4  ;;  %s80_s28 = sshll.u32 %s183_s3, 4  ;;  %vm71_vm1 = vcmask 9216   ;;  %s79_s25 = int_to_ptr.vmem [resolvable:$true] %s78_s25  ;;  %s81_s28 = int_to_ptr.hbm [resolvable:$true] %s80_s28 }
   0x5   :  { %v17_v5 = vpack.c.bf16 %v16_v4, %v16_v4  ;;  %v111_v6 = vld [vmem:[%s182_s2] ss:$0 sm:$0xff] }
   0x6   :  { %63 = vmatpush.bf16.msra.mxu0 %v108_v1 }
   0xa   :  { %64 = vmatpush.bf16.msra.mxu0 %v107_v2 }
   0xe   :  { %65 = vmatpush.bf16.msra.mxu0 %v106_v3 }
  0x11   :  { %105 = vmatmul.msk.bf16.vlgmr.msra.gmra.mxu0 %vm54_vm0, %v17_v5 }
  0x8e   :  { %v67_v7 = vpop.f32.mrf.mxu0 }
  0x8f   :  { %v68_v8 = vadd.f32 %v111_v6, %v67_v7 }
  0x91   :  { %72 = vst.msk [vmem:[#allocation2] sm:$0x3] %vm71_vm1, %v68_v8 }
  0x92   :  { %83 = dma.vmem_to_hbm [thread:$0]  %s79_s25, 32, %s81_s28, [#allocation3]  }
  0x96   :  { %v69_v9 = vpop.f32.mrf.mxu0 }
  0x97   :  { %136 = dma.done.wait [#allocation3], 32  }
  0x98   :  { %137 = vsyncadd [#allocation3], 4294967264 }
  0x99   :  { %88 = vsyncpa [#allocation3], 1 }

</bundles_post_ra>
